<compile_context>
chip_gen: v7x
topology: tpu7x:2x2x1
jax: 0.10.0
libtpu: 0.0.40
codegen_flags: <defaults>
</compile_context>

<pallas_src>
import jax
import jax.numpy as jnp
from jax.experimental import pallas as pl
from jax.experimental.pallas import tpu as pltpu


def _round_up(a, b):
    return (a + b - 1) // b * b


def _patch_embed_kernel(x_ref, w_ref, b_ref, o_ref):
    # x_ref: (TM, K_pad) compute-dtype patches
    # w_ref: (K_pad, E)  compute-dtype weight (resident; constant index_map)
    # b_ref: (1, E)      f32 bias
    # o_ref: (TM, E)     out-dtype output
    acc = jnp.dot(x_ref[...], w_ref[...], preferred_element_type=jnp.float32)
    o_ref[...] = (acc + b_ref[...]).astype(o_ref.dtype)


def patch_embed(x, weight, bias, patch_size, *, tile_m=1024,
                compute_dtype=jnp.bfloat16, out_dtype=jnp.bfloat16):
    """Equivalent of PatchEmbed.forward.

    x:      (B, C, H, W)  float32  (NCHW, like PyTorch)
    weight: (E, C, P, P)  float32  (Conv2d weight layout)
    bias:   (E,)          float32
    returns (B, N, E) with N = (H//P) * (W//P), dtype = out_dtype.

    Set compute_dtype=jnp.float32 / out_dtype=jnp.float32 for a pure-f32 path if
    strict numerical parity with the PyTorch f32 conv is required.
    """
    B, C, H, W = x.shape
    P = patch_size
    assert H % P == 0 and W % P == 0
    E = weight.shape[0]
    Hp, Wp = H // P, W // P
    N = Hp * Wp
    K = C * P * P
    M = B * N

    # K is the lane dim of the patch tile / sublane dim of the weight: pad to 128
    # (zeros contribute nothing to the accumulate). The pad fuses into the same
    # XLA copy that materializes the patches, so it costs no extra HBM pass.
    K_pad = _round_up(K, 128)

    # --- wrapper glue: one fused pass (f32 read -> bf16 transpose + pad write) ----
    # Cast first so the transpose writes 2 B/elt, not 4 B/elt.
    xc = x.astype(compute_dtype)
    patches = (
        xc.reshape(B, C, Hp, P, Wp, P)
        .transpose(0, 2, 4, 1, 3, 5)          # (B, Hp, Wp, C, P, P)
        .reshape(M, K)
    )
    if K_pad != K:
        patches = jnp.pad(patches, ((0, 0), (0, K_pad - K)))

    w2 = weight.reshape(E, K).T.astype(compute_dtype)                 # (K, E), tiny
    if K_pad != K:
        w2 = jnp.pad(w2, ((0, K_pad - K), (0, 0)))                    # (K_pad, E)
    b2 = bias.reshape(1, E).astype(jnp.float32)                       # (1, E)

    # --- tiling -------------------------------------------------------------------
    TM = min(tile_m, _round_up(M, 8))
    # v7x has 2 TensorCores: prefer >= 2 grid steps when there is enough work.
    if M >= 512 and pl.cdiv(M, TM) < 2:
        TM = max(256, _round_up(pl.cdiv(M, 2), 256))

    in_bytes = jnp.dtype(compute_dtype).itemsize
    out_bytes = jnp.dtype(out_dtype).itemsize

    def _vmem_est(tm):
        return (2 * tm * K_pad * in_bytes        # double-buffered patch tiles
                + 2 * tm * E * out_bytes         # double-buffered output tiles
                + 2 * K_pad * E * in_bytes       # weight (allocated x2, DMA'd once)
                + 2 * 8 * 128 * 4)               # bias (one padded tile) x2

    # Keep the double-buffered footprint comfortably inside v7x's 64 MiB VMEM.
    while _vmem_est(TM) > 40 * 1024 * 1024 and TM > 256:
        TM //= 2
    vmem_limit = int(min(56 * 1024 * 1024, max(16 * 1024 * 1024, 2 * _vmem_est(TM))))

    grid_m = pl.cdiv(M, TM)   # ragged last tile handled by Pallas (no M pad / slice)

    out = pl.pallas_call(
        _patch_embed_kernel,
        out_shape=jax.ShapeDtypeStruct((M, E), out_dtype),
        grid_spec=pltpu.PrefetchScalarGridSpec(
            num_scalar_prefetch=0,
            grid=(grid_m,),
            in_specs=[
                pl.BlockSpec((TM, K_pad), lambda i: (i, 0)),
                # Constant index_map => fetched once, never re-DMA'd across steps.
                pl.BlockSpec((K_pad, E), lambda i: (0, 0)),
                pl.BlockSpec((1, E), lambda i: (0, 0)),
            ],
            out_specs=pl.BlockSpec((TM, E), lambda i: (i, 0)),
        ),
        compiler_params=pltpu.CompilerParams(
            dimension_semantics=("parallel",),
            vmem_limit_bytes=vmem_limit,
        ),
        cost_estimate=pl.CostEstimate(
            flops=2 * M * K_pad * E,
            bytes_accessed=(M * K_pad * in_bytes     # patch read
                            + K_pad * E * in_bytes   # weight read (once)
                            + E * 4                  # bias read
                            + M * E * out_bytes),    # output write
            transcendentals=0,
        ),
    )(patches, w2, b2)

    return out.reshape(B, N, E)


if __name__ == "__main__":
    # Small deterministic config consistent with the module.
    B, C, H, W = 2, 4, 16, 16
    patch_size = 4
    embed_dim = 32

    key = jax.random.PRNGKey(0)
    kx, kw, kb = jax.random.split(key, 3)
    x = jax.random.normal(kx, (B, C, H, W), dtype=jnp.float32)
    weight = jax.random.normal(kw, (embed_dim, C, patch_size, patch_size),
                               dtype=jnp.float32) * 0.02
    bias = jax.random.normal(kb, (embed_dim,), dtype=jnp.float32) * 0.02

    out = patch_embed(x, weight, bias, patch_size)
    out = jax.block_until_ready(out)

    # Pure-JAX reference (conv via lax) to sanity-check semantics.
    ref = jax.lax.conv_general_dilated(
        x, weight,
        window_strides=(patch_size, patch_size),
        padding="VALID",
        dimension_numbers=("NCHW", "OIHW", "NCHW"),
    ) + bias.reshape(1, embed_dim, 1, 1)
    ref = ref.reshape(B, embed_dim, -1).transpose(0, 2, 1)

    N = (H // patch_size) * (W // patch_size)
    assert out.shape == (B, N, embed_dim)
    out_f32 = out.astype(jnp.float32)
    # bf16 operands + bf16 output (f32 accumulation) -> slightly looser tolerance.
    assert jnp.allclose(out_f32, ref, atol=2e-2, rtol=2e-2), \
        float(jnp.max(jnp.abs(out_f32 - ref)))
    print("KERNEL_OK")
</pallas_src>

<mosaic_0001>
module attributes {stable_mosaic.version = 11 : i64} {
  func.func @_patch_embed_kernel(%arg0: i32, %arg1: memref<32x128xbf16, #tpu.memory_space<vmem>>, %arg2: memref<128x32xbf16, #tpu.memory_space<vmem>>, %arg3: memref<1x32xf32, #tpu.memory_space<vmem>>, %arg4: memref<32x32xbf16, #tpu.memory_space<vmem>>) attributes {dimension_semantics = [#tpu.dimension_semantics<parallel>], iteration_bounds = array<i64: 1>, scalar_prefetch = 0 : i64, scratch_operands = 0 : i64, tpu.core_type = #tpu.core_type<tc>, window_params = [{transform_indices = @transform_0, window_bounds = array<i64: 32, 128>}, {pipeline_mode = #tpu.pipeline_mode<synchronous>, transform_indices = @transform_1, window_bounds = array<i64: 128, 32>}, {pipeline_mode = #tpu.pipeline_mode<synchronous>, transform_indices = @transform_2, window_bounds = array<i64: 1, 32>}, {transform_indices = @transform_3, window_bounds = array<i64: 32, 32>}]} {
    %c0 = arith.constant 0 : index
    %c0_0 = arith.constant 0 : index
    %0 = vector.load %arg1[%c0, %c0_0] : memref<32x128xbf16, #tpu.memory_space<vmem>>, vector<32x128xbf16>
    %c0_1 = arith.constant 0 : index
    %c0_2 = arith.constant 0 : index
    %1 = vector.load %arg2[%c0_1, %c0_2] : memref<128x32xbf16, #tpu.memory_space<vmem>>, vector<128x32xbf16>
    %cst = arith.constant dense<0.000000e+00> : vector<32x32xf32>
    %2 = tpu.matmul %0, %1, %cst {dimension_numbers = #tpu.dot_dimension_numbers<[1], [0], [0], [1], [0, 0, 1, 1], [], []>} : vector<32x128xbf16>, vector<128x32xbf16>, vector<32x32xf32> -> vector<32x32xf32>
    %c0_3 = arith.constant 0 : index
    %c0_4 = arith.constant 0 : index
    %3 = vector.load %arg3[%c0_3, %c0_4] : memref<1x32xf32, #tpu.memory_space<vmem>>, vector<1x32xf32>
    %4 = vector.broadcast %3 : vector<1x32xf32> to vector<32x32xf32>
    %5 = arith.addf %2, %4 : vector<32x32xf32>
    %6 = arith.truncf %5 : vector<32x32xf32> to vector<32x32xbf16>
    %c0_5 = arith.constant 0 : index
    %c0_6 = arith.constant 0 : index
    %7 = vector.load %arg4[%c0_5, %c0_6] : memref<32x32xbf16, #tpu.memory_space<vmem>>, vector<32x32xbf16>
    tpu.vector_store %arg4[%c0_5, %c0_6], %6 {strides = array<i32>} : memref<32x32xbf16, #tpu.memory_space<vmem>>, vector<32x32xbf16>,
    return
  }
  func.func @transform_0(%arg0: i32) -> (i32, i32) {
    %c0_i32 = arith.constant 0 : i32
    %c0_i32_0 = arith.constant 0 : i32
    return %arg0, %c0_i32 : i32, i32
  }
  func.func @transform_1(%arg0: i32) -> (i32, i32) {
    %c0_i32 = arith.constant 0 : i32
    %c0_i32_0 = arith.constant 0 : i32
    %c0_i32_1 = arith.constant 0 : i32
    return %c0_i32, %c0_i32_0 : i32, i32
  }
  func.func @transform_2(%arg0: i32) -> (i32, i32) {
    %c0_i32 = arith.constant 0 : i32
    %c0_i32_0 = arith.constant 0 : i32
    %c0_i32_1 = arith.constant 0 : i32
    return %c0_i32, %c0_i32_0 : i32, i32
  }
  func.func @transform_3(%arg0: i32) -> (i32, i32) {
    %c0_i32 = arith.constant 0 : i32
    %c0_i32_0 = arith.constant 0 : i32
    return %arg0, %c0_i32 : i32, i32
  }
}

</mosaic_0001>

<bundles_post_ra>
// kernel: tpu_custom_call.1
= control target key start
LH: loop header
LB: loop body
LE: loop exit
PB: predicated region body
PF: predicated region fallthrough
CT: control target
= control target key end

     0   :  { %s347_s0 = inlined_call_operand.vmem [shape: bf16[32,128], index: 0, kind: input, shape index: {}]   ;;  %s348_s1 = inlined_call_operand.vmem [shape: bf16[128,32], index: 1, kind: input, shape index: {}]   ;;  %s349_s2 = inlined_call_operand.vmem [shape: f32[1,32], index: 2, kind: input, shape index: {}]   ;;  %s350_s3 = inlined_call_operand.hbm [shape: bf16[32,32], index: 3, kind: output, shape index: {}]  }
   0x1   :  { %v241_v0 = vld [vmem:[%s348_s1] sm:$0xff]   ;;  %v242_v1 = vld [vmem:[%s348_s1 + $0x8] sm:$0xff]   ;;  %v243_v2 = vld [vmem:[%s348_s1 + $0x10] sm:$0xff]  }
   0x2   :  { %218 = vmatprep.subr.bf16.mxu0 %v241_v0  ;;  %v244_v3 = vld [vmem:[%s348_s1 + $0x18] sm:$0xff]   ;;  %v249_v4 = vld [vmem:[%s347_s0] sm:$0xff]  }
   0x3   :  { %219 = vmatpush3.bf16.msra.mxu0 %v241_v0  ;;  %234 = vmatprep.mubr.bf16.mxu0 %v249_v4 }
   0x4   :  { %220 = vmatprep.subr.bf16.mxu0 %v242_v1 }
   0x7   :  { %221 = vmatpush3.bf16.msra.mxu0 %v242_v1 }
   0x8   :  { %222 = vmatprep.subr.bf16.mxu0 %v243_v2 }
   0x9   :  { %8 = vsyncpa [#allocation3], 0  ;;  %v245_v5 = vld [vmem:[%s348_s1 + $0x20] sm:$0xff]   ;;  %v246_v6 = vld [vmem:[%s348_s1 + $0x28] sm:$0xff]   ;;  %vm168_vm0 = vcmask 257024   ;;  %s275_s7 = smov [#allocation2]  }
   0xa   :  { %v247_v7 = vld [vmem:[%s348_s1 + $0x30] sm:$0xff]   ;;  %v248_v8 = vld [vmem:[%s348_s1 + $0x38] sm:$0xff]   ;;  %v250_v9 = vld [vmem:[%s347_s0 + $0x8] sm:$0xff]   ;;  %s178_s1 = sshll.u32 %s275_s7, 4  ;;  %s179_s1 = int_to_ptr.vmem [resolvable:$true] %s178_s1 }
   0xb   :  { %223 = vmatpush3.bf16.msra.mxu0 %v243_v2  ;;  %v189_v10 = vld [vmem:[%s349_s2] ss:$0 sm:$0xff]  ;;  %s251_s0 = scalar_lea.vmem %s179_s1, 256  ;;  %p256_p1 = scmp.lt.s32.totalorder %s179_s1, %s179_s1 }
   0xc   :  { %224 = vmatprep.subr.bf16.mxu0 %v244_v3  ;;  %p252_p0 = scmp.ne.s32.totalorder %s179_s1, %s251_s0  ;;  %p257_p2 = scmp.lt.s32.totalorder %s251_s0, %s251_s0 }
   0xe   :  { %p258_p3 = por %p257_p2, %p256_p1 }
   0xf   :  { %225 = vmatpush3.bf16.msra.mxu0 %v244_v3 }
  0x10   :  { %226 = vmatprep.subr.bf16.mxu0 %v245_v5  ;;  %p259_p4 = pnand %p258_p3, %p252_p0 }
  0x13   :  { %227 = vmatpush3.bf16.msra.mxu0 %v245_v5 }
  0x14   :  { %228 = vmatprep.subr.bf16.mxu0 %v246_v6 }
  0x17   :  { %229 = vmatpush3.bf16.msra.mxu0 %v246_v6 }
  0x18   :  { %230 = vmatprep.subr.bf16.mxu0 %v247_v7 }
  0x1b   :  { %231 = vmatpush3.bf16.msra.mxu0 %v247_v7 }
  0x1c   :  { %232 = vmatprep.subr.bf16.mxu0 %v248_v8 }
  0x1f   :  { %233 = vmatpush3.bf16.msra.mxu0 %v248_v8 }
  0x22   :  { %235 = vmatmul.mubr.bf16.vlgmr.msra.gmra.mrb[0].mxu0 %v250_v9 }
  0xf5   :  { %v236_v11 = vpop.f32.mrb[0].mxu0 }
  0xf6   :  { %v146_v12 = vadd.f32 %v236_v11, %v189_v10  ;;  %v137_v13 = vpop.f32.mrb[1].mxu0 }
  0xf7   :  { %v138_v14 = vadd.f32 %v189_v10, %v137_v13  ;;  %v237_v15 = vpop.f32.mrb[2].mxu0 }
  0xf8   :  { %v206_v16 = vpack.c.bf16 %v146_v12, %v146_v12  ;;  %v149_v17 = vadd.f32 %v237_v15, %v189_v10  ;;  %v140_v18 = vpop.f32.mrb[3].mxu0 }
  0xf9   :  { %v204_v19 = vpack.c.bf16 %v138_v14, %v138_v14  ;;  %v141_v20 = vadd.f32 %v189_v10, %v140_v18 }
  0xfa   :  { %171 = vst.msk [vmem:[#allocation2 + $0x8] sm:$0xf] %vm168_vm0, %v206_v16  ;;  %v207_v21 = vpack.c.bf16 %v149_v17, %v149_v17 }
  0xfb   :  { %169 = vst.msk [vmem:[#allocation2] sm:$0xf] %vm168_vm0, %v204_v19  ;;  %v205_v22 = vpack.c.bf16 %v141_v20, %v141_v20 }
  0xfc   :  { %172 = vst.msk [vmem:[#allocation2 + $0xc] sm:$0xf] %vm168_vm0, %v207_v21 }
  0xfd   :  { %170 = vst.msk [vmem:[#allocation2 + $0x4] sm:$0xf] %vm168_vm0, %v205_v22 }
  0xfe   :  { %262 = shalt.err (!%p259_p4)
}
  0xff   :  { %s263_s9 = scalar_lea.hbm %s350_s3, 256 }
 0x100   :  { %p264_p5 = scmp.ne.s32.totalorder %s350_s3, %s263_s9  ;;  %p267_p6 = scmp.lt.u32.totalorder %s263_s9, %s350_s3 }
 0x102   :  { %p269_p7 = pnand %p267_p6, %p264_p5 }
 0x104   :  { %272 = shalt.err (!%p269_p7)
}
 0x105   :  { %s276_s14 = smov 64   ;;  %s277_s15 = smov 4  }
 0x106   :  { %184 = dma.vmem_to_hbm [thread:$0]  %s179_s1, 256, %s350_s3, [#allocation3], %s276_s14, %s276_s14, %s277_s15  }
 0x107   :  { %273 = dma.done.wait [#allocation3], 256  }
 0x108   :  { %274 = vsyncadd [#allocation3], 4294967040 }
 0x109   :  { %188 = vsyncpa [#allocation3], 1 }

</bundles_post_ra>
